<compile_context>
chip_gen: v7x
topology: tpu7x:2x2x1
jax: 0.10.0
libtpu: 0.0.40
codegen_flags: <defaults>
</compile_context>

<pallas_src>
import functools

import jax
import jax.numpy as jnp
from jax.experimental import pallas as pl
from jax.experimental.pallas import tpu as pltpu

HIDDEN_REP_DIM = 300   # module fixes self.hidden_rep_dim = 300
NUM_CLASSES = 10       # module default num_classes = 10
LANE = 128             # lane offset of the W_anchor half in the fused RHS


# ----------------------------- Pallas kernel -------------------------------
def _ant_kernel(lhs_ref, w_ref, b_ref, mu_ref, std_ref, *, n_anchors):
    """Single-invocation ANT head, one fused MXU push.

    lhs_ref [(N+1)*G, H]   bf16   rows 0..G-1 = hidden_rep, rows G.. = anchors
    w_ref   [H, 128+C]     bf16   lanes 0..C-1 = W_diff, lanes 128.. = W_anchor
    b_ref   [1, C]         f32    classifier bias
    mu_ref  [G, C]         f32    calibrated mean prediction
    std_ref [G, C]         f32    unbiased std of sigmoid(preds) over anchors
    """
    G, C = mu_ref.shape

    # One MXU push for hidden_rep AND all anchors against BOTH weight halves.
    out = jnp.dot(lhs_ref[...], w_ref[...],
                  preferred_element_type=jnp.float32)       # [(N+1)*G, 128+C]

    h_wd = out[0:G, 0:C]                                     # h @ W_diff
    bias = b_ref[...]

    # Per-anchor logits + stats. n_anchors is small & static -> unrolled VPU
    # ops on tile-aligned [G, C] slices (G == 8 sublanes, lane offsets 0/128).
    # TODO(synk): for n_anchors >~ 16 switch these unrolled lists to two
    # lax.fori_loop passes (or Welford) to bound vreg live ranges.
    inv_n = 1.0 / n_anchors
    logits = []
    for n in range(n_anchors):
        r0 = (n + 1) * G
        a_wd = out[r0:r0 + G, 0:C]                           # a_n @ W_diff
        a_wa = out[r0:r0 + G, LANE:LANE + C]                 # a_n @ W_anchor
        # cat(h - a, a) @ [Wd; Wa] + b  ==  h@Wd - a@Wd + a@Wa + b
        logits.append(h_wd - a_wd + a_wa + bias)
    sigs = [jax.nn.sigmoid(l) for l in logits]

    mu = sum(logits) * inv_n                                 # preds.mean(dim=0)
    mean_sig = sum(sigs) * inv_n
    # Two-pass unbiased variance over anchors (torch .std default, ddof=1).
    var = sum((s - mean_sig) * (s - mean_sig) for s in sigs)
    var = var * (1.0 / (n_anchors - 1))
    std = jnp.sqrt(var)
    std_ref[...] = std

    # calibrate: c = mean(std, dim=1, keepdim) ; mu / (1 + exp(c)) == mu * sigmoid(-c)
    c = jnp.mean(std, axis=1, keepdims=True)
    mu_ref[...] = mu * jax.nn.sigmoid(-c)                    # EUP, no VPU divide


def prepare_classifier_weights(w_cls, b_cls, hidden_dim=HIDDEN_REP_DIM,
                               num_classes=NUM_CLASSES):
    """One-time weight prep (do NOT redo per call): fused bf16 RHS with
    W_diff at lane 0 and W_anchor at lane 128 (vreg-aligned result slices)."""
    H, C = hidden_dim, num_classes
    w_fused = jnp.zeros((H, LANE + C), dtype=jnp.bfloat16)
    w_fused = w_fused.at[:, :C].set(w_cls[:H, :].astype(jnp.bfloat16))
    w_fused = w_fused.at[:, LANE:LANE + C].set(w_cls[H:, :].astype(jnp.bfloat16))
    b2 = b_cls.reshape(1, C).astype(jnp.float32)
    return w_fused, b2


def graph_ant_forward(hidden_rep_b, anchors_b, w_fused, b2):
    """hidden_rep_b [G, H] bf16, anchors_b [N, G, H] bf16 (cast at producer),
    w_fused [H, 128+C] bf16, b2 [1, C] f32."""
    n_anchors, G, H = anchors_b.shape
    C = b2.shape[1]
    if n_anchors < 2:
        # torch module: "Use n_anchor>1, std. dev cannot be computed!"
        raise ValueError("n_anchors must be >= 2 to compute the anchor std.")

    # Stack hidden_rep on top of the flattened anchors -> one LHS, one DMA.
    lhs = jnp.concatenate(
        [hidden_rep_b, anchors_b.reshape(n_anchors * G, H)], axis=0)

    # TODO(synk): for large G, add a leading grid axis over G-tiles marked
    # "parallel" (anchors iterated inside the body) so v7x's two TensorCores
    # split the work; size the G-tile against v7x's 64 MiB (32 MiB scoped)
    # VMEM, and pad/pack the outputs lane-dense once writeback matters.
    kernel = functools.partial(_ant_kernel, n_anchors=n_anchors)
    mu_cal, std = pl.pallas_call(
        kernel,
        out_shape=(jax.ShapeDtypeStruct((G, C), jnp.float32),
                   jax.ShapeDtypeStruct((G, C), jnp.float32)),
        in_specs=[
            pl.BlockSpec(memory_space=pltpu.MemorySpace.VMEM),   # stacked LHS
            pl.BlockSpec(memory_space=pltpu.MemorySpace.VMEM),   # fused weights
            pl.BlockSpec(memory_space=pltpu.MemorySpace.VMEM),   # bias
        ],
        out_specs=(
            pl.BlockSpec(memory_space=pltpu.MemorySpace.VMEM),   # calibrated mu
            pl.BlockSpec(memory_space=pltpu.MemorySpace.VMEM),   # std
        ),
    )(lhs, w_fused, b2)
    return mu_cal, std


# ----------------------------- plain-JAX glue -------------------------------
def forward_features_pre(node_x, graph_id, num_graphs, w_pre, b_pre):
    """Synthetic stand-in for base_network.forward_features_pre:
    linear node embedding followed by per-graph mean pooling."""
    node_h = node_x @ w_pre + b_pre                       # [num_nodes, H]
    one_hot = jax.nn.one_hot(graph_id, num_graphs, dtype=node_h.dtype)
    summed = one_hot.T @ node_h                           # [G, H]
    counts = jnp.maximum(one_hot.sum(axis=0, keepdims=True).T, 1.0)
    return summed / counts                                # [G, H] f32


def make_batch_anchors(hidden_rep_b, n_anchors, key):
    """anchor_type='batch', anchors=None path: per-anchor random permutation
    of the (detached) hidden representations. Operates on the bf16 producer
    output so the kernel inputs need no further casts."""
    G = hidden_rep_b.shape[0]
    anchors = []
    for _ in range(n_anchors):
        key, sub = jax.random.split(key)
        perm = jax.random.permutation(sub, G)
        anchors.append(hidden_rep_b[perm])
    return jnp.stack(anchors, axis=0)                     # [N, G, H] bf16


def reference(hidden_rep_b, anchors_b, w_cls, b_cls):
    """Pure-JAX reference of the module's forward (concat formula ->
    mean / sigmoid-std / calibrate), evaluated on the SAME bf16-quantized
    h / anchors / weights the kernel consumes, so the comparison isolates
    kernel logic from input quantization."""
    H = hidden_rep_b.shape[1]
    h = hidden_rep_b.astype(jnp.float32)
    anc = anchors_b.astype(jnp.float32)
    w_q = jnp.concatenate(
        [w_cls[:H, :].astype(jnp.bfloat16).astype(jnp.float32),
         w_cls[H:, :].astype(jnp.bfloat16).astype(jnp.float32)], axis=0)
    b = b_cls.astype(jnp.float32)

    preds = []
    for n in range(anchors_b.shape[0]):
        a = anc[n]
        new_feats = jnp.concatenate([h - a, a], axis=1)
        preds.append(jnp.dot(new_feats, w_q,
                             precision=jax.lax.Precision.HIGHEST) + b)
    preds = jnp.stack(preds, axis=0)
    mu = preds.mean(axis=0)
    std = jnp.std(jax.nn.sigmoid(preds), axis=0, ddof=1)
    c = std.mean(axis=1, keepdims=True)
    return mu / (1.0 + jnp.exp(c)), std


# ---------------------------------- main ------------------------------------
if __name__ == "__main__":
    key = jax.random.PRNGKey(0)
    k_x, k_wp, k_bp, k_wc, k_bc, k_anc = jax.random.split(key, 6)

    num_graphs = 8
    nodes_per_graph = 4
    num_nodes = num_graphs * nodes_per_graph
    x_dim = 16
    n_anchors = 4
    H, C = HIDDEN_REP_DIM, NUM_CLASSES

    # deterministic synthetic inputs / parameters
    node_x = jax.random.normal(k_x, (num_nodes, x_dim), dtype=jnp.float32)
    graph_id = jnp.repeat(jnp.arange(num_graphs), nodes_per_graph)
    w_pre = jax.random.normal(k_wp, (x_dim, H), dtype=jnp.float32) * 0.1
    b_pre = jax.random.normal(k_bp, (H,), dtype=jnp.float32) * 0.01
    w_cls = jax.random.normal(k_wc, (2 * H, C), dtype=jnp.float32) * 0.05
    b_cls = jax.random.normal(k_bc, (C,), dtype=jnp.float32) * 0.01

    # forward_features_pre (glue, plain JAX); bf16 cast at the producer.
    hidden_rep = forward_features_pre(node_x, graph_id, num_graphs, w_pre, b_pre)
    hidden_rep_b = hidden_rep.astype(jnp.bfloat16)

    # anchor_type='batch': anchors are permuted hidden reps (stop-gradient in torch)
    anchors_b = jax.lax.stop_gradient(
        make_batch_anchors(hidden_rep_b, n_anchors, k_anc))

    # one-time classifier weight prep (fused bf16 RHS + f32 bias)
    w_fused, b2 = prepare_classifier_weights(w_cls, b_cls, H, C)

    # Pallas hot path: anchored classifier over anchors + mean/std/calibrate
    mu_cal, std = graph_ant_forward(hidden_rep_b, anchors_b, w_fused, b2)
    mu_cal, std = jax.block_until_ready((mu_cal, std))

    # correctness check against pure-JAX reference (same bf16-quantized operands)
    mu_ref, std_ref = reference(hidden_rep_b, anchors_b, w_cls, b_cls)
    assert mu_cal.shape == (num_graphs, C) and std.shape == (num_graphs, C)
    assert jnp.allclose(mu_cal, mu_ref, rtol=1e-3, atol=1e-4), (
        float(jnp.max(jnp.abs(mu_cal - mu_ref))))
    assert jnp.allclose(std, std_ref, rtol=1e-3, atol=1e-4), (
        float(jnp.max(jnp.abs(std - std_ref))))

    print("KERNEL_OK")
</pallas_src>

<mosaic_0001>
module attributes {stable_mosaic.version = 11 : i64} {
  func.func @_ant_kernel(%arg0: memref<40x300xbf16, #tpu.memory_space<vmem>>, %arg1: memref<300x138xbf16, #tpu.memory_space<vmem>>, %arg2: memref<1x10xf32, #tpu.memory_space<vmem>>, %arg3: memref<8x10xf32, #tpu.memory_space<vmem>>, %arg4: memref<8x10xf32, #tpu.memory_space<vmem>>) attributes {dimension_semantics = [], scalar_prefetch = 0 : i64, scratch_operands = 0 : i64, tpu.core_type = #tpu.core_type<tc>} {
    %c0 = arith.constant 0 : index
    %c0_0 = arith.constant 0 : index
    %0 = vector.load %arg0[%c0, %c0_0] : memref<40x300xbf16, #tpu.memory_space<vmem>>, vector<40x300xbf16>
    %c0_1 = arith.constant 0 : index
    %c0_2 = arith.constant 0 : index
    %1 = vector.load %arg1[%c0_1, %c0_2] : memref<300x138xbf16, #tpu.memory_space<vmem>>, vector<300x138xbf16>
    %cst = arith.constant dense<0.000000e+00> : vector<40x138xf32>
    %2 = tpu.matmul %0, %1, %cst {dimension_numbers = #tpu.dot_dimension_numbers<[1], [0], [0], [1], [0, 0, 1, 1], [], []>} : vector<40x300xbf16>, vector<300x138xbf16>, vector<40x138xf32> -> vector<40x138xf32>
    %3 = vector.extract_strided_slice %2 {offsets = [0, 0], sizes = [8, 10], strides = [1, 1]} : vector<40x138xf32> to vector<8x10xf32>
    %c0_3 = arith.constant 0 : index
    %c0_4 = arith.constant 0 : index
    %4 = vector.load %arg2[%c0_3, %c0_4] : memref<1x10xf32, #tpu.memory_space<vmem>>, vector<1x10xf32>
    %5 = vector.extract_strided_slice %2 {offsets = [8, 0], sizes = [8, 10], strides = [1, 1]} : vector<40x138xf32> to vector<8x10xf32>
    %6 = vector.extract_strided_slice %2 {offsets = [8, 128], sizes = [8, 10], strides = [1, 1]} : vector<40x138xf32> to vector<8x10xf32>
    %7 = arith.subf %3, %5 : vector<8x10xf32>
    %8 = arith.addf %7, %6 : vector<8x10xf32>
    %9 = vector.broadcast %4 : vector<1x10xf32> to vector<8x10xf32>
    %10 = arith.addf %8, %9 : vector<8x10xf32>
    %11 = vector.extract_strided_slice %2 {offsets = [16, 0], sizes = [8, 10], strides = [1, 1]} : vector<40x138xf32> to vector<8x10xf32>
    %12 = vector.extract_strided_slice %2 {offsets = [16, 128], sizes = [8, 10], strides = [1, 1]} : vector<40x138xf32> to vector<8x10xf32>
    %13 = arith.subf %3, %11 : vector<8x10xf32>
    %14 = arith.addf %13, %12 : vector<8x10xf32>
    %15 = vector.broadcast %4 : vector<1x10xf32> to vector<8x10xf32>
    %16 = arith.addf %14, %15 : vector<8x10xf32>
    %17 = vector.extract_strided_slice %2 {offsets = [24, 0], sizes = [8, 10], strides = [1, 1]} : vector<40x138xf32> to vector<8x10xf32>
    %18 = vector.extract_strided_slice %2 {offsets = [24, 128], sizes = [8, 10], strides = [1, 1]} : vector<40x138xf32> to vector<8x10xf32>
    %19 = arith.subf %3, %17 : vector<8x10xf32>
    %20 = arith.addf %19, %18 : vector<8x10xf32>
    %21 = vector.broadcast %4 : vector<1x10xf32> to vector<8x10xf32>
    %22 = arith.addf %20, %21 : vector<8x10xf32>
    %23 = vector.extract_strided_slice %2 {offsets = [32, 0], sizes = [8, 10], strides = [1, 1]} : vector<40x138xf32> to vector<8x10xf32>
    %24 = vector.extract_strided_slice %2 {offsets = [32, 128], sizes = [8, 10], strides = [1, 1]} : vector<40x138xf32> to vector<8x10xf32>
    %25 = arith.subf %3, %23 : vector<8x10xf32>
    %26 = arith.addf %25, %24 : vector<8x10xf32>
    %27 = vector.broadcast %4 : vector<1x10xf32> to vector<8x10xf32>
    %28 = arith.addf %26, %27 : vector<8x10xf32>
    %29 = arith.negf %10 : vector<8x10xf32>
    %30 = math.exp %29 : vector<8x10xf32>
    %cst_5 = arith.constant 1.000000e+00 : f32
    %31 = vector.broadcast %cst_5 : f32 to vector<8x10xf32>
    %32 = arith.addf %31, %30 : vector<8x10xf32>
    %33 = arith.divf %31, %32 : vector<8x10xf32>
    %34 = arith.negf %16 : vector<8x10xf32>
    %35 = math.exp %34 : vector<8x10xf32>
    %cst_6 = arith.constant 1.000000e+00 : f32
    %36 = vector.broadcast %cst_6 : f32 to vector<8x10xf32>
    %37 = arith.addf %36, %35 : vector<8x10xf32>
    %38 = arith.divf %36, %37 : vector<8x10xf32>
    %39 = arith.negf %22 : vector<8x10xf32>
    %40 = math.exp %39 : vector<8x10xf32>
    %cst_7 = arith.constant 1.000000e+00 : f32
    %41 = vector.broadcast %cst_7 : f32 to vector<8x10xf32>
    %42 = arith.addf %41, %40 : vector<8x10xf32>
    %43 = arith.divf %41, %42 : vector<8x10xf32>
    %44 = arith.negf %28 : vector<8x10xf32>
    %45 = math.exp %44 : vector<8x10xf32>
    %cst_8 = arith.constant 1.000000e+00 : f32
    %46 = vector.broadcast %cst_8 : f32 to vector<8x10xf32>
    %47 = arith.addf %46, %45 : vector<8x10xf32>
    %48 = arith.divf %46, %47 : vector<8x10xf32>
    %cst_9 = arith.constant 0.000000e+00 : f32
    %49 = vector.broadcast %cst_9 : f32 to vector<8x10xf32>
    %50 = arith.addf %49, %10 : vector<8x10xf32>
    %51 = arith.addf %50, %16 : vector<8x10xf32>
    %52 = arith.addf %51, %22 : vector<8x10xf32>
    %53 = arith.addf %52, %28 : vector<8x10xf32>
    %cst_10 = arith.constant 2.500000e-01 : f32
    %54 = vector.broadcast %cst_10 : f32 to vector<8x10xf32>
    %55 = arith.mulf %53, %54 : vector<8x10xf32>
    %cst_11 = arith.constant 0.000000e+00 : f32
    %56 = vector.broadcast %cst_11 : f32 to vector<8x10xf32>
    %57 = arith.addf %56, %33 : vector<8x10xf32>
    %58 = arith.addf %57, %38 : vector<8x10xf32>
    %59 = arith.addf %58, %43 : vector<8x10xf32>
    %60 = arith.addf %59, %48 : vector<8x10xf32>
    %cst_12 = arith.constant 2.500000e-01 : f32
    %61 = vector.broadcast %cst_12 : f32 to vector<8x10xf32>
    %62 = arith.mulf %60, %61 : vector<8x10xf32>
    %63 = arith.subf %33, %62 : vector<8x10xf32>
    %64 = arith.subf %33, %62 : vector<8x10xf32>
    %65 = arith.mulf %63, %64 : vector<8x10xf32>
    %cst_13 = arith.constant 0.000000e+00 : f32
    %66 = vector.broadcast %cst_13 : f32 to vector<8x10xf32>
    %67 = arith.addf %66, %65 : vector<8x10xf32>
    %68 = arith.subf %38, %62 : vector<8x10xf32>
    %69 = arith.subf %38, %62 : vector<8x10xf32>
    %70 = arith.mulf %68, %69 : vector<8x10xf32>
    %71 = arith.addf %67, %70 : vector<8x10xf32>
    %72 = arith.subf %43, %62 : vector<8x10xf32>
    %73 = arith.subf %43, %62 : vector<8x10xf32>
    %74 = arith.mulf %72, %73 : vector<8x10xf32>
    %75 = arith.addf %71, %74 : vector<8x10xf32>
    %76 = arith.subf %48, %62 : vector<8x10xf32>
    %77 = arith.subf %48, %62 : vector<8x10xf32>
    %78 = arith.mulf %76, %77 : vector<8x10xf32>
    %79 = arith.addf %75, %78 : vector<8x10xf32>
    %cst_14 = arith.constant 0.333333343 : f32
    %80 = vector.broadcast %cst_14 : f32 to vector<8x10xf32>
    %81 = arith.mulf %79, %80 : vector<8x10xf32>
    %82 = math.sqrt %81 : vector<8x10xf32>
    %c0_15 = arith.constant 0 : index
    %c0_16 = arith.constant 0 : index
    %83 = vector.load %arg4[%c0_15, %c0_16] : memref<8x10xf32, #tpu.memory_space<vmem>>, vector<8x10xf32>
    tpu.vector_store %arg4[%c0_15, %c0_16], %82 {strides = array<i32>} : memref<8x10xf32, #tpu.memory_space<vmem>>, vector<8x10xf32>,
    %cst_17 = arith.constant dense<0.000000e+00> : vector<8xf32>
    %84 = vector.multi_reduction <add>, %82, %cst_17 [1] : vector<8x10xf32> to vector<8xf32>
    %85 = vector.shape_cast %84 : vector<8xf32> to vector<8x1xf32>
    %cst_18 = arith.constant 1.000000e+01 : f32
    %86 = vector.broadcast %cst_18 : f32 to vector<8x1xf32>
    %87 = arith.divf %85, %86 : vector<8x1xf32>
    %cst_19 = arith.constant 0.000000e+00 : f32
    %88 = vector.broadcast %cst_19 : f32 to vector<8x1xf32>
    %89 = arith.subf %88, %87 : vector<8x1xf32>
    %90 = arith.negf %89 : vector<8x1xf32>
    %91 = math.exp %90 : vector<8x1xf32>
    %cst_20 = arith.constant 1.000000e+00 : f32
    %92 = vector.broadcast %cst_20 : f32 to vector<8x1xf32>
    %93 = arith.addf %92, %91 : vector<8x1xf32>
    %94 = arith.divf %92, %93 : vector<8x1xf32>
    %95 = vector.broadcast %94 : vector<8x1xf32> to vector<8x10xf32>
    %96 = arith.mulf %55, %95 : vector<8x10xf32>
    %c0_21 = arith.constant 0 : index
    %c0_22 = arith.constant 0 : index
    %97 = vector.load %arg3[%c0_21, %c0_22] : memref<8x10xf32, #tpu.memory_space<vmem>>, vector<8x10xf32>
    tpu.vector_store %arg3[%c0_21, %c0_22], %96 {strides = array<i32>} : memref<8x10xf32, #tpu.memory_space<vmem>>, vector<8x10xf32>,
    return
  }
}

</mosaic_0001>

<bundles_post_ra>
// kernel: tpu_custom_call.1
= control target key start
LH: loop header
LB: loop body
LE: loop exit
PB: predicated region body
PF: predicated region fallthrough
CT: control target
= control target key end

     0   :  { %10 = vsyncpa [#allocation3], 0  ;;  %v751_v2 = vmov 0   ;;  %vm305_vm0 = vcmask 1045504   ;;  %vm295_vm1 = vcmask 359424   ;;  %s956_s0 = inlined_call_operand.vmem [shape: bf16[40,300], index: 0, kind: input, shape index: {}]   ;;  %s957_s1 = inlined_call_operand.vmem [shape: bf16[300,138], index: 1, kind: input, shape index: {}]   ;;  %s958_s2 = inlined_call_operand.vmem [shape: f32[1,10], index: 2, kind: input, shape index: {}]   ;;  %s959_s3 = inlined_call_operand.hbm [shape: f32[8,10], index: 3, kind: output, shape index: {0}]   ;;  %s960_s4 = inlined_call_operand.hbm [shape: f32[8,10], index: 4, kind: output, shape index: {1}]  }
   0x1   :  { %v613_v0 = vld [vmem:[%s957_s1 + $0x4] ss:$8 sps:$4 sm:$0xff]   ;;  %v615_v1 = vld [vmem:[%s957_s1] ss:$8 sps:$4 sm:$0xff]   ;;  %404 = vmatprep.mubr.bf16.mxu0 %v751_v2  ;;  %v616_v3 = vld [vmem:[%s957_s1 + $0x14] ss:$8 sps:$4 sm:$0xff]  }
   0x2   :  { %312 = vmatprep.subr.bf16.mxu1 %v613_v0  ;;  %v618_v4 = vld [vmem:[%s957_s1 + $0x10] ss:$8 sps:$4 sm:$0xff]   ;;  %v619_v5 = vld [vmem:[%s957_s1 + $0x24] ss:$8 sps:$4 sm:$0xff]   ;;  %v621_v6 = vld [vmem:[%s957_s1 + $0x20] ss:$8 sps:$4 sm:$0xff]  }
   0x3   :  { %313 = vmatpush1.bf16.msra.mxu1 %v615_v1  ;;  %v622_v7 = vld [vmem:[%s957_s1 + $0x34] ss:$8 sps:$4 sm:$0xff]   ;;  %v624_v8 = vld [vmem:[%s957_s1 + $0x30] ss:$8 sps:$4 sm:$0xff]   ;;  %v625_v9 = vld [vmem:[%s957_s1 + $0x44] ss:$8 sps:$4 sm:$0xff]  }
   0x4   :  { %314 = vmatprep.subr.bf16.mxu1 %v616_v3  ;;  %v627_v10 = vld [vmem:[%s957_s1 + $0x40] ss:$8 sps:$4 sm:$0xff]   ;;  %v628_v11 = vld [vmem:[%s957_s1 + $0x54] ss:$8 sps:$4 sm:$0xff]   ;;  %v652_v12 = vld [vmem:[%s957_s1 + $0x104] ss:$8 sps:$4 sm:$0xff]  }
   0x5   :  { %v654_v13 = vld [vmem:[%s957_s1 + $0x100] ss:$8 sps:$4 sm:$0xff]   ;;  %v630_v14 = vld [vmem:[%s957_s1 + $0x50] ss:$8 sps:$4 sm:$0xff]   ;;  %v631_v15 = vld [vmem:[%s957_s1 + $0x64] ss:$8 sps:$4 sm:$0xff]   ;;  %372 = vmatprep.subr.bf16.mxu0 %v652_v12 }
   0x6   :  { %v658_v16 = vld [vmem:[%s957_s1 + $0x114] ss:$8 sps:$4 sm:$0xff]   ;;  %373 = vmatpush1.bf16.msra.mxu0 %v654_v13  ;;  %v660_v17 = vld [vmem:[%s957_s1 + $0x110] ss:$8 sps:$4 sm:$0xff]   ;;  %v633_v18 = vld [vmem:[%s957_s1 + $0x60] ss:$8 sps:$4 sm:$0xff]  }
   0x7   :  { %315 = vmatpush1.bf16.msra.mxu1 %v618_v4  ;;  %374 = vmatprep.subr.bf16.mxu0 %v658_v16  ;;  %v664_v19 = vld [vmem:[%s957_s1 + $0x124] ss:$8 sps:$4 sm:$0x3f]   ;;  %v634_v20 = vld [vmem:[%s957_s1 + $0x74] ss:$8 sps:$4 sm:$0xff]  }
   0x8   :  { %316 = vmatprep.subr.bf16.mxu1 %v619_v5  ;;  %v666_v21 = vld [vmem:[%s957_s1 + $0x120] ss:$8 sps:$4 sm:$0x3f]   ;;  %v636_v22 = vld [vmem:[%s957_s1 + $0x70] ss:$8 sps:$4 sm:$0xff]  }
   0x9   :  { %v307_v23 = vsel %vm305_vm0, %v666_v21, 0  ;;  %v637_v24 = vld [vmem:[%s957_s1 + $0x84] ss:$8 sps:$4 sm:$0xff]   ;;  %v670_v26 = vld [vmem:[%s956_s0 + $0x8] ss:$12 sps:$4 sm:$0xff]  }
   0xa   :  { %375 = vmatpush1.bf16.msra.mxu0 %v660_v17  ;;  %v673_v25 = vld [vmem:[%s956_s0 + $0x4] ss:$12 sps:$4 sm:$0xff]   ;;  %v639_v27 = vld [vmem:[%s957_s1 + $0x80] ss:$8 sps:$4 sm:$0xff]  }
   0xb   :  { %317 = vmatpush1.bf16.msra.mxu1 %v621_v6  ;;  %596 = vmatprep.subr.msk.bf16.mxu0 %vm305_vm0, %v664_v19 }
   0xc   :  { %318 = vmatprep.subr.bf16.mxu1 %v622_v7  ;;  %344 = vmatprep.mubr.bf16.mxu1 %v673_v25 }
   0xe   :  { %377 = vmatpush1.bf16.msra.mxu0 %v307_v23 }
   0xf   :  { %319 = vmatpush1.bf16.msra.mxu1 %v624_v8 }
  0x10   :  { %320 = vmatprep.subr.bf16.mxu1 %v625_v9 }
  0x13   :  { %321 = vmatpush1.bf16.msra.mxu1 %v627_v10 }
  0x14   :  { %322 = vmatprep.subr.bf16.mxu1 %v628_v11 }
  0x17   :  { %323 = vmatpush1.bf16.msra.mxu1 %v630_v14 }
  0x18   :  { %324 = vmatprep.subr.bf16.mxu1 %v631_v15 }
  0x1b   :  { %325 = vmatpush1.bf16.msra.mxu1 %v633_v18 }
  0x1c   :  { %326 = vmatprep.subr.bf16.mxu1 %v634_v20 }
  0x1f   :  { %327 = vmatpush1.bf16.msra.mxu1 %v636_v22 }
  0x20   :  { %11 = vsyncpa [#allocation5], 0  ;;  %328 = vmatprep.subr.bf16.mxu1 %v637_v24  ;;  %v640_v28 = vld [vmem:[%s957_s1 + $0x94] ss:$8 sps:$4 sm:$0xff]   ;;  %597 = vmatmul.mubr.msk.bf16.vlgmr.msra.gmra.mrb[0].mxu0 %vm295_vm1, %v670_v26  ;;  %v642_v29 = vld [vmem:[%s957_s1 + $0x90] ss:$8 sps:$4 sm:$0xff]  }
  0x21   :  { %413 = vmatprep.mubr.bf16.mxu0 %v751_v2  ;;  %v643_v30 = vld [vmem:[%s957_s1 + $0xa4] ss:$8 sps:$4 sm:$0xff]   ;;  %v645_v32 = vld [vmem:[%s957_s1 + $0xa0] ss:$8 sps:$4 sm:$0xff]   ;;  %v646_v33 = vld [vmem:[%s957_s1 + $0xb4] ss:$8 sps:$4 sm:$0xff]  }
  0x22   :  { %v674_v31 = vld [vmem:[%s956_s0 + $0x20] ss:$12 sps:$4 sm:$0xff]   ;;  %v648_v34 = vld [vmem:[%s957_s1 + $0xb0] ss:$8 sps:$4 sm:$0xff]   ;;  %v655_v38 = vld [vmem:[%s957_s1 + $0xd4] ss:$8 sps:$4 sm:$0xff]  }
  0x23   :  { %329 = vmatpush1.bf16.msra.mxu1 %v639_v27  ;;  %v649_v35 = vld [vmem:[%s957_s1 + $0xc4] ss:$8 sps:$4 sm:$0xff]   ;;  %v678_v36 = vld [vmem:[%s956_s0 + $0x38] ss:$0 sps:$4 sm:$0xff]   ;;  %v651_v37 = vld [vmem:[%s957_s1 + $0xc0] ss:$8 sps:$4 sm:$0xff]  }
  0x24   :  { %330 = vmatprep.subr.bf16.mxu1 %v640_v28  ;;  %v657_v39 = vld [vmem:[%s957_s1 + $0xd0] ss:$8 sps:$4 sm:$0xff]   ;;  %v661_v40 = vld [vmem:[%s957_s1 + $0xe4] ss:$8 sps:$4 sm:$0xff]   ;;  %v663_v41 = vld [vmem:[%s957_s1 + $0xe0] ss:$8 sps:$4 sm:$0xff]  }
  0x25   :  { %v667_v42 = vld [vmem:[%s957_s1 + $0xf4] ss:$8 sps:$4 sm:$0xff]   ;;  %v669_v43 = vld [vmem:[%s957_s1 + $0xf0] ss:$8 sps:$4 sm:$0xff]   ;;  %v671_v44 = vld [vmem:[%s956_s0] ss:$12 sps:$4 sm:$0xff]  }
  0x26   :  { %v675_v45 = vld [vmem:[%s956_s0 + $0x1c] ss:$12 sps:$4 sm:$0xff]   ;;  %v27_v46 = vld [vmem:[%s956_s0 + $0x30] sm:$0xff]  ;;  %v677_v47 = vld [vmem:[%s956_s0 + $0x18] ss:$12 sps:$4 sm:$0xff]   ;;  %vm505_vm3 = vcmask 80896  }
  0x27   :  { %331 = vmatpush1.bf16.msra.mxu1 %v642_v29  ;;  %v556_v48 = vcombine.high %v27_v46, %v27_v46  ;;  %v555_v49 = vcombine.low %v27_v46, %v27_v46  ;;  %v600_v6 = vld [vmem:[%s958_s2] ss:$0 sm:$0xff]  ;;  %s752_s2 = smov [#allocation4]  }
  0x28   :  { %332 = vmatprep.subr.bf16.mxu1 %v643_v30  ;;  %598 = vmatmul.mubr.msk.bf16.gmra.mrb[4].mxu0 %vm295_vm1, %v674_v31  ;;  %s537_s29 = sshll.u32 %s752_s2, 4  ;;  %s538_s29 = int_to_ptr.vmem [resolvable:$true] %s537_s29 }
  0x29   :  { %423 = vmatprep.mubr.bf16.mxu0 %v751_v2  ;;  %s703_s30 = scalar_lea.vmem %s538_s29, 128  ;;  %p708_p1 = scmp.lt.s32.totalorder %s538_s29, %s538_s29 }
  0x2a   :  { %p704_p0 = scmp.ne.s32.totalorder %s538_s29, %s703_s30  ;;  %p709_p2 = scmp.lt.s32.totalorder %s703_s30, %s703_s30 }
  0x2b   :  { %333 = vmatpush1.bf16.msra.mxu1 %v645_v32 }
  0x2c   :  { %334 = vmatprep.subr.bf16.mxu1 %v646_v33  ;;  %p710_p3 = por %p709_p2, %p708_p1 }
  0x2e   :  { %p711_p4 = pnand %p710_p3, %p704_p0 }
  0x2f   :  { %335 = vmatpush1.bf16.msra.mxu1 %v648_v34 }
  0x30   :  { %336 = vmatprep.subr.bf16.mxu1 %v649_v35  ;;  %599 = vmatmul.mubr.msk.bf16.gmra.mrb[8].mxu0 %vm295_vm1, %v678_v36 }
  0x33   :  { %337 = vmatpush1.bf16.msra.mxu1 %v651_v37 }
  0x34   :  { %338 = vmatprep.subr.bf16.mxu1 %v655_v38 }
  0x37   :  { %339 = vmatpush1.bf16.msra.mxu1 %v657_v39 }
  0x38   :  { %340 = vmatprep.subr.bf16.mxu1 %v661_v40 }
  0x3b   :  { %341 = vmatpush1.bf16.msra.mxu1 %v663_v41 }
  0x3c   :  { %342 = vmatprep.subr.bf16.mxu1 %v667_v42 }
  0x3f   :  { %343 = vmatpush1.bf16.msra.mxu1 %v669_v43 }
  0x42   :  { %345 = vmatmul.mubr.bf16.vlgmr.msra.gmra.mrb[0].mxu1 %v671_v44 }
  0x43   :  { %353 = vmatprep.mubr.bf16.mxu1 %v675_v45 }
  0x4a   :  { %354 = vmatmul.mubr.bf16.gmra.mrb[4].mxu1 %v677_v47 }
  0x4b   :  { %363 = vmatprep.mubr.bf16.mxu1 %v556_v48 }
  0x52   :  { %364 = vmatmul.mubr.bf16.gmra.mrb[8].mxu1 %v555_v49 }
  0xf3   :  { %v406_v50 = vpop.f32.mrb[0].mxu0 }
  0xf4   :  { %v408_v51 = vpop.f32.mrb[1].mxu0 }
  0xf5   :  { %v409_v52 = vpop.f32.mrb[2].mxu0 }
  0xf6   :  { %v411_v53 = vpop.f32.mrb[3].mxu0 }
  0xfb   :  { %v415_v54 = vpop.f32.mrb[4].mxu0 }
  0xfc   :  { %v417_v55 = vpop.f32.mrb[5].mxu0 }
  0xfd   :  { %v419_v56 = vpop.f32.mrb[6].mxu0 }
  0xfe   :  { %v421_v57 = vpop.f32.mrb[7].mxu0 }
 0x103   :  { %v425_v58 = vpop.f32.mrb[8].mxu0 }
 0x104   :  { %v427_v59 = vpop.f32.mrb[9].mxu0 }
 0x105   :  { %v429_v60 = vpop.f32.mrb[10].mxu0 }
 0x106   :  { %v430_v61 = vpop.f32.mrb[11].mxu0 }
 0x115   :  { %v346_v62 = vpop.f32.mrb[0].mxu1 }
 0x116   :  { %v407_v63 = vadd.f32 %v406_v50, %v346_v62  ;;  %v348_v0 = vpop.f32.mrb[1].mxu1 }
 0x117   :  { %v349_v1 = vpop.f32.mrb[2].mxu1 }
 0x118   :  { %v410_v2 = vadd.f32 %v409_v52, %v349_v1  ;;  %v351_v3 = vpop.f32.mrb[3].mxu1 }
 0x119   :  { %v412_v4 = vadd.f32 %v411_v53, %v351_v3 }
 0x11a   :  { %v433_v5 = vsub.f32 %v407_v63, %v410_v2 }
 0x11c   :  { %v434_v7 = vadd.f32 %v433_v5, %v412_v4 }
 0x11d   :  { %v355_v8 = vpop.f32.mrb[4].mxu1 }
 0x11e   :  { %v441_v9 = vadd.f32 %v600_v6, %v434_v7  ;;  %v416_v10 = vadd.f32 %v415_v54, %v355_v8  ;;  %v357_v11 = vpop.f32.mrb[5].mxu1 }
 0x11f   :  { %v418_v12 = vadd.f32 %v417_v55, %v357_v11  ;;  %v359_v13 = vpop.f32.mrb[6].mxu1 }
 0x120   :  { %v601_v14 = vmul.f32 -1.442695, %v441_v9  ;;  %v442_v15 = vsub.f32 %v407_v63, %v416_v10  ;;  %v420_v16 = vadd.f32 %v419_v56, %v359_v13  ;;  %v361_v17 = vpop.f32.mrb[7].mxu1 }
 0x121   :  { %v422_v18 = vadd.f32 %v421_v57, %v361_v17 }
 0x122   :  { %v443_v19 = vadd.f32 %v442_v15, %v418_v12  ;;  %v445_v20 = vsub.f32 %v407_v63, %v420_v16  ;;  %681 = vpow2.f32 %v601_v14 }
 0x124   :  { %v444_v21 = vadd.f32 %v600_v6, %v443_v19  ;;  %v446_v22 = vadd.f32 %v445_v20, %v422_v18 }
 0x125   :  { %v365_v23 = vpop.f32.mrb[8].mxu1 }
 0x126   :  { %v602_v24 = vmul.f32 -1.442695, %v444_v21  ;;  %v476_v25 = vadd.f32 %v444_v21, %v441_v9  ;;  %v447_v26 = vadd.f32 %v600_v6, %v446_v22  ;;  %v426_v27 = vadd.f32 %v425_v58, %v365_v23  ;;  %v367_v28 = vpop.f32.mrb[9].mxu1 }
 0x127   :  { %v428_v29 = vadd.f32 %v427_v59, %v367_v28  ;;  %v369_v30 = vpop.f32.mrb[10].mxu1 }
 0x128   :  { %683 = vpow2.f32 %v602_v24  ;;  %v603_v31 = vmul.f32 -1.442695, %v447_v26  ;;  %v477_v32 = vadd.f32 %v476_v25, %v447_v26  ;;  %v448_v33 = vsub.f32 %v407_v63, %v426_v27  ;;  %v370_v34 = vpop.f32.mrb[11].mxu1 }
 0x12a   :  { %685 = vpow2.f32 %v603_v31  ;;  %v449_v35 = vadd.f32 %v448_v33, %v428_v29 }
 0x12c   :  { %v450_v36 = vadd.f32 %v600_v6, %v449_v35  ;;  %v682_v37 = vpop.eup %681 }
 0x12d   :  { %v454_v40 = vadd.f32 1.0, %v682_v37 }
 0x12e   :  { %v604_v38 = vmul.f32 -1.442695, %v450_v36  ;;  %v926_v39 = vadd.f32 %v477_v32, %v450_v36 }
 0x130   :  { %687 = vpow2.f32 %v604_v38 }
 0x131   :  { %689 = vrcp.f32 %v454_v40 }
 0x132   :  { %v684_v41 = vpop.eup %683 }
 0x133   :  { %v460_v42 = vadd.f32 1.0, %v684_v41 }
 0x134   :  { %v686_v43 = vpop.eup %685 }
 0x135   :  { %691 = vrcp.f32 %v460_v42  ;;  %v466_v44 = vadd.f32 1.0, %v686_v43 }
 0x137   :  { %693 = vrcp.f32 %v466_v44 }
 0x13a   :  { %v688_v45 = vpop.eup %687 }
 0x13b   :  { %v472_v46 = vadd.f32 1.0, %v688_v45  ;;  %v690_v47 = vpop.eup %689 }
 0x13d   :  { %695 = vrcp.f32 %v472_v46 }
 0x13f   :  { %v692_v48 = vpop.eup %691 }
 0x140   :  { %v481_v49 = vadd.f32 %v692_v48, %v690_v47 }
 0x141   :  { %v694_v50 = vpop.eup %693 }
 0x142   :  { %v482_v51 = vadd.f32 %v694_v50, %v481_v49 }
 0x147   :  { %v696_v52 = vpop.eup %695 }
 0x148   :  { %v483_v53 = vadd.f32 %v696_v52, %v482_v51 }
 0x14a   :  { %v484_v54 = vmul.f32 0.25, %v483_v53 }
 0x14c   :  { %v494_v55 = vsub.f32 %v696_v52, %v484_v54  ;;  %v485_v56 = vsub.f32 %v690_v47, %v484_v54  ;;  %v488_v57 = vsub.f32 %v692_v48, %v484_v54  ;;  %v491_v58 = vsub.f32 %v694_v50, %v484_v54 }
 0x14e   :  { %v486_v59 = vmul.f32 %v485_v56, %v485_v56  ;;  %v489_v60 = vmul.f32 %v488_v57, %v488_v57  ;;  %v492_v62 = vmul.f32 %v491_v58, %v491_v58  ;;  %v495_v63 = vmul.f32 %v494_v55, %v494_v55 }
 0x150   :  { %v490_v61 = vadd.f32 %v489_v60, %v486_v59 }
 0x152   :  { %v493_v0 = vadd.f32 %v492_v62, %v490_v61 }
 0x154   :  { %v496_v1 = vadd.f32 %v495_v63, %v493_v0 }
 0x156   :  { %v497_v2 = vmul.f32 0.33333334, %v496_v1 }
 0x158   :  { %697 = vrsqrt.f32 %v497_v2  ;;  %vm500_vm2 = vcmp.eq.f32.partialorder %v497_v2, inf  ;;  %v503_v5 = vand.u32 2147483648, %v497_v2  ;;  %vm502_vm4 = vcmp.eq.f32.partialorder %v497_v2, 0.0 }
 0x162   :  { %v698_v3 = vpop.eup %697 }
 0x163   :  { %v499_v4 = vmul.f32 %v698_v3, %v497_v2 }
 0x165   :  { %v501_v6 = vsel %vm500_vm2, %v497_v2, %v499_v4 }
 0x166   :  { %v504_v7 = vsel %vm502_vm4, %v503_v5, %v501_v6 }
 0x167   :  { %v507_v8 = vsel %vm505_vm3, %v504_v7, 0.0  ;;  %506 = vst.msk [vmem:[#allocation4] sm:$0xff] %vm505_vm3, %v504_v7 }
 0x168   :  { %508 = vadd.xlane.f32.xlu0 %v507_v8 }
 0x169   :  { %714 = shalt.err (!%p711_p4)
}
 0x16a   :  { %s715_s7 = scalar_lea.hbm %s960_s4, 128 }
 0x16b   :  { %p716_p5 = scmp.ne.s32.totalorder %s960_s4, %s715_s7  ;;  %p719_p6 = scmp.lt.u32.totalorder %s715_s7, %s960_s4 }
 0x16d   :  { %p721_p7 = pnand %p719_p6, %p716_p5 }
 0x16f   :  { %724 = shalt.err (!%p721_p7)
}
 0x170   :  { %540 = dma.vmem_to_hbm [thread:$0]  %s538_s29, 128, %s960_s4, [#allocation5]   ;;  %v479_v15 = vmul.f32 0.25, %v926_v39 }
 0x171   :  { %s753_s14 = smov [#allocation2]  }
 0x172   :  { %s527_s15 = sshll.u32 %s753_s14, 4  ;;  %s528_s15 = int_to_ptr.vmem [resolvable:$true] %s527_s15 }
 0x173   :  { %s725_s16 = scalar_lea.vmem %s528_s15, 128  ;;  %p730_p9 = scmp.lt.s32.totalorder %s528_s15, %s528_s15 }
 0x174   :  { %p726_p8 = scmp.ne.s32.totalorder %s528_s15, %s725_s16  ;;  %p731_p10 = scmp.lt.s32.totalorder %s725_s16, %s725_s16 }
 0x176   :  { %p732_p11 = por %p731_p10, %p730_p9 }
 0x178   :  { %p733_p12 = pnand %p732_p11, %p726_p8 }
 0x1f5   :  { %v509_v9 = vpop.xlane.xlu0 %508 }
 0x1f6   :  { %v511_v10 = vmul.f32 0.1, %v509_v9 }
 0x1f8   :  { %v512_v11 = vsub.f32 0.0, %v511_v10 }
 0x1fa   :  { %v605_v12 = vmul.f32 -1.442695, %v512_v11 }
 0x1fc   :  { %699 = vpow2.f32 %v605_v12 }
 0x206   :  { %v700_v13 = vpop.eup %699 }
 0x207   :  { %v516_v14 = vadd.f32 1.0, %v700_v13 }
 0x209   :  { %701 = vrcp.f32 %v516_v14 }
 0x213   :  { %v702_v16 = vpop.eup %701 }
 0x214   :  { %v519_v17 = vmul.f32 %v702_v16, %v479_v15 }
 0x216   :  { %520 = vst.msk [vmem:[#allocation2] sm:$0xff] %vm505_vm3, %v519_v17 }
 0x217   :  { %736 = shalt.err (!%p733_p12)
}
 0x218   :  { %s737_s18 = scalar_lea.hbm %s959_s3, 128 }
 0x219   :  { %p738_p13 = scmp.ne.s32.totalorder %s959_s3, %s737_s18  ;;  %p741_p0 = scmp.lt.u32.totalorder %s737_s18, %s959_s3 }
 0x21b   :  { %p743_p1 = pnand %p741_p0, %p738_p13 }
 0x21d   :  { %746 = shalt.err (!%p743_p1)
}
 0x21e   :  { %530 = dma.vmem_to_hbm [thread:$0]  %s528_s15, 128, %s959_s3, [#allocation3]  }
 0x21f   :  { %747 = dma.done.wait [#allocation3], 128  }
 0x220   :  { %748 = vsyncadd [#allocation3], 4294967168 }
 0x221   :  { %749 = dma.done.wait [#allocation5], 128  }
 0x222   :  { %750 = vsyncadd [#allocation5], 4294967168 }
 0x223   :  { %547 = vsyncpa [#allocation3], 1 }
 0x224   :  { %548 = vsyncpa [#allocation5], 1 }

</bundles_post_ra>
